<compile_context>
chip_gen: v5e
topology: v5e:2x2
jax: 0.10.0
libtpu: 0.0.40
codegen_flags: <defaults>
</compile_context>

<pallas_src>
import math

import jax
import jax.numpy as jnp
from jax.experimental import pallas as pl
from jax.experimental.pallas import tpu as pltpu

NEG_SLOPE = 0.2
BN_EPS = 1e-5


def _leaky(h):
    return jnp.where(h > 0, h, NEG_SLOPE * h)


def _batchnorm(h, gamma, beta):
    # PyTorch BatchNorm1d in training mode (module default right after __init__):
    # per-channel batch statistics with biased variance.
    mean = jnp.mean(h, axis=0, keepdims=True)
    var = jnp.mean((h - mean) ** 2, axis=0, keepdims=True)
    return (h - mean) * jax.lax.rsqrt(var + BN_EPS) * gamma + beta


def _im2col_k4s2(src_ref, *, n_batch, l_in, l_out):
    """(N*Lin, Cin) ref -> (N*Lout, 4*Cin) im2col value for a kernel=4, stride=2 VALID conv.

    Only two strided sublane reads per batch (even rows / odd rows); taps k=0,2 and k=1,3
    are cheap static sub-slices of those buffers. Column order is k-major (k*Cin + c), which
    matches w.reshape(K*Cin, Cout) of a (K, Cin, Cout) weight.
    """
    rows = []
    for b in range(n_batch):  # tiny batch -> fully unrolled
        base = b * l_in
        even = src_ref[pl.ds(base, l_out + 1, 2), :]      # rows base + 2j        (j = 0..Lout)
        odd = src_ref[pl.ds(base + 1, l_out + 1, 2), :]   # rows base + 2j + 1
        taps = [even[:l_out, :],   # k = 0
                odd[:l_out, :],    # k = 1
                even[1:, :],       # k = 2
                odd[1:, :]]        # k = 3
        rows.append(jnp.concatenate(taps, axis=1))        # (Lout, 4*Cin)
    return jnp.concatenate(rows, axis=0)                  # (N*Lout, 4*Cin)


def make_discriminator_call(n, image_nc, length):
    assert length >= 4, "sequence too short for kernel_size=4"
    l1 = (length - 4) // 2 + 1
    assert l1 >= 4, "layer-2 input too short for kernel_size=4"
    l2 = (l1 - 4) // 2 + 1
    assert l2 >= 4, "layer-3 input too short for kernel_size=4"
    l3 = (l2 - 4) // 2 + 1

    def kernel(x_ref, w1_ref, w2_ref, w3_ref, p_ref, out_ref, h1_ref, h2_ref):
        # Unpack the small per-channel params: one (9, 32) load, then register-level slices.
        p = p_ref[...]
        b1 = p[0:1, 0:8]
        b2 = p[1:2, 0:16]
        g2 = p[2:3, 0:16]
        be2 = p[3:4, 0:16]
        b3 = p[4:5, :]
        g3 = p[5:6, :]
        be3 = p[6:7, :]
        w4 = p[7:8, :]
        b4 = p[8:9, 0:1]

        # layer 1: Conv1d(image_nc -> 8, k=4, s=2) + LeakyReLU(0.2)
        # one im2col matmul over all batches; bias + activation fused into the single store.
        c1 = _im2col_k4s2(x_ref, n_batch=n, l_in=length, l_out=l1)
        h1_ref[...] = _leaky(
            jnp.dot(c1, w1_ref[...], preferred_element_type=jnp.float32) + b1)

        # layer 2: Conv1d(8 -> 16, k=4, s=2) + BatchNorm1d(16) + LeakyReLU(0.2), fused store.
        # (the conv bias is mathematically absorbed by BN mean subtraction, but it is kept for
        #  bit-exact parity with the PyTorch module; it costs a single tiny vadd.)
        c2 = _im2col_k4s2(h1_ref, n_batch=n, l_in=l1, l_out=l2)
        z2 = jnp.dot(c2, w2_ref[...], preferred_element_type=jnp.float32) + b2
        h2_ref[...] = _leaky(_batchnorm(z2, g2, be2))

        # layer 3: Conv1d(16 -> 32, k=4, s=2) + BatchNorm1d(32) + LeakyReLU(0.2); result stays
        # in registers (layer 4 needs no strided reads, so no scratch buffer).
        c3 = _im2col_k4s2(h2_ref, n_batch=n, l_in=l2, l_out=l3)
        z3 = jnp.dot(c3, w3_ref[...], preferred_element_type=jnp.float32) + b3
        h3 = _leaky(_batchnorm(z3, g3, be3))

        # layer 4: Conv1d(32 -> 1, k=1) + Sigmoid as a VPU broadcast-multiply + lane reduce
        # (a (.,32)x(32,1) matmul would waste an entire MXU pass for a lane-width-1 output).
        z4 = jnp.sum(h3 * w4, axis=1, keepdims=True) + b4
        out_ref[...] = jax.nn.sigmoid(z4)

    flops = 2 * n * (l1 * (4 * image_nc) * 8 + l2 * 32 * 16 + l3 * 64 * 32 + l3 * 32)
    bytes_accessed = 4 * (n * length * image_nc                        # input
                          + 4 * image_nc * 8 + 32 * 16 + 64 * 32       # conv weights
                          + 9 * 32                                     # packed small params
                          + n * l3)                                    # output
    cost = pl.CostEstimate(flops=flops, transcendentals=n * l3 + 48,
                           bytes_accessed=bytes_accessed)

    vmem_spec = lambda: pl.BlockSpec(memory_space=pltpu.MemorySpace.VMEM)
    call = pl.pallas_call(
        kernel,
        out_shape=jax.ShapeDtypeStruct((n * l3, 1), jnp.float32),
        in_specs=[vmem_spec() for _ in range(5)],
        out_specs=vmem_spec(),
        scratch_shapes=[
            pltpu.VMEM((n * l1, 8), jnp.float32),
            pltpu.VMEM((n * l2, 16), jnp.float32),
        ],
        cost_estimate=cost,
    )
    return call, (l1, l2, l3)


def init_params(key, image_nc):
    """Deterministic, PyTorch-like init (uniform +/- 1/sqrt(fan_in)); BN gamma=1, beta=0."""
    def conv_init(k, cin, cout, ksize):
        bound = 1.0 / math.sqrt(cin * ksize)
        kw, kb = jax.random.split(k)
        w = jax.random.uniform(kw, (ksize, cin, cout), jnp.float32, -bound, bound)
        b = jax.random.uniform(kb, (1, cout), jnp.float32, -bound, bound)
        return w, b

    k1, k2, k3, k4 = jax.random.split(key, 4)
    w1, b1 = conv_init(k1, image_nc, 8, 4)
    w2, b2 = conv_init(k2, 8, 16, 4)
    w3, b3 = conv_init(k3, 16, 32, 4)
    w4_k, b4 = conv_init(k4, 32, 1, 1)
    w4 = w4_k[0]  # (32, 1) for the 1x1 conv
    g2, be2 = jnp.ones((1, 16), jnp.float32), jnp.zeros((1, 16), jnp.float32)
    g3, be3 = jnp.ones((1, 32), jnp.float32), jnp.zeros((1, 32), jnp.float32)
    return dict(w1=w1, b1=b1, w2=w2, b2=b2, g2=g2, be2=be2,
                w3=w3, b3=b3, g3=g3, be3=be3, w4=w4, b4=b4)


def pack_small_params(params):
    """Pack all per-channel vectors + the 1x1-conv weight into one (9, 32) f32 array."""
    p = jnp.zeros((9, 32), jnp.float32)
    p = p.at[0, :8].set(params["b1"][0])
    p = p.at[1, :16].set(params["b2"][0])
    p = p.at[2, :16].set(params["g2"][0])
    p = p.at[3, :16].set(params["be2"][0])
    p = p.at[4, :].set(params["b3"][0])
    p = p.at[5, :].set(params["g3"][0])
    p = p.at[6, :].set(params["be3"][0])
    p = p.at[7, :].set(params["w4"].reshape(32))
    p = p.at[8, 0].set(params["b4"][0, 0])
    return p


def discriminator_forward(x_ncl, params):
    """x_ncl: (N, C, L) float32 — same layout as the PyTorch module input."""
    n, c, length = x_ncl.shape
    call, (_, _, l3) = make_discriminator_call(n, c, length)
    # Host-side layout glue (free): NCL -> channels-last (N*L, C); weights -> (K*Cin, Cout).
    x_flat = jnp.transpose(x_ncl, (0, 2, 1)).reshape(n * length, c)
    w1f = params["w1"].reshape(4 * c, 8)
    w2f = params["w2"].reshape(4 * 8, 16)
    w3f = params["w3"].reshape(4 * 16, 32)
    packed = pack_small_params(params)
    out = call(x_flat, w1f, w2f, w3f, packed)
    return out.reshape(n, l3)  # matches PyTorch .squeeze() of (N, 1, L3)


def reference_forward(x_ncl, params):
    """Independent pure-JAX reference (NCL layout, like PyTorch)."""
    def conv(x, w_kio, b, stride):
        w_oik = jnp.transpose(w_kio, (2, 1, 0))  # (Cout, Cin, K)
        y = jax.lax.conv_general_dilated(
            x, w_oik, window_strides=(stride,), padding="VALID",
            dimension_numbers=("NCH", "OIH", "NCH"))
        return y + b.reshape(1, -1, 1)

    def bn(x, g, be):
        mean = jnp.mean(x, axis=(0, 2), keepdims=True)
        var = jnp.mean((x - mean) ** 2, axis=(0, 2), keepdims=True)
        return (x - mean) * jax.lax.rsqrt(var + BN_EPS) * g.reshape(1, -1, 1) + be.reshape(1, -1, 1)

    leaky = lambda h: jnp.where(h > 0, h, NEG_SLOPE * h)
    h = leaky(conv(x_ncl, params["w1"], params["b1"], 2))
    h = leaky(bn(conv(h, params["w2"], params["b2"], 2), params["g2"], params["be2"]))
    h = leaky(bn(conv(h, params["w3"], params["b3"], 2), params["g3"], params["be3"]))
    h = conv(h, params["w4"][None], params["b4"], 1)  # (32,1) -> (1,32,1) KIO
    return jax.nn.sigmoid(h).squeeze()


if __name__ == "__main__":
    N, IMAGE_NC, L = 2, 4, 64  # small shapes; L=64 -> 31 -> 14 -> 6

    key = jax.random.PRNGKey(0)
    kx, kp = jax.random.split(key)
    x = jax.random.normal(kx, (N, IMAGE_NC, L), jnp.float32)
    params = init_params(kp, IMAGE_NC)

    out = discriminator_forward(x, params)
    out = jax.block_until_ready(out)

    ref = jax.block_until_ready(reference_forward(x, params))
    assert out.shape == (N, 6), out.shape
    assert jnp.allclose(out, ref, atol=1e-5, rtol=1e-4), float(jnp.max(jnp.abs(out - ref)))

    print("KERNEL_OK")
</pallas_src>

<mosaic_0001>
module attributes {stable_mosaic.version = 11 : i64} {
  func.func @kernel(%arg0: memref<128x4xf32, #tpu.memory_space<vmem>>, %arg1: memref<16x8xf32, #tpu.memory_space<vmem>>, %arg2: memref<32x16xf32, #tpu.memory_space<vmem>>, %arg3: memref<64x32xf32, #tpu.memory_space<vmem>>, %arg4: memref<9x32xf32, #tpu.memory_space<vmem>>, %arg5: memref<12x1xf32, #tpu.memory_space<vmem>>, %arg6: memref<62x8xf32, #tpu.memory_space<vmem>>, %arg7: memref<28x16xf32, #tpu.memory_space<vmem>>) attributes {dimension_semantics = [], scalar_prefetch = 0 : i64, scratch_operands = 2 : i64, tpu.core_type = #tpu.core_type<tc>} {
    %c0 = arith.constant 0 : index
    %c0_0 = arith.constant 0 : index
    %0 = vector.load %arg4[%c0, %c0_0] : memref<9x32xf32, #tpu.memory_space<vmem>>, vector<9x32xf32>
    %1 = vector.extract_strided_slice %0 {offsets = [0, 0], sizes = [1, 8], strides = [1, 1]} : vector<9x32xf32> to vector<1x8xf32>
    %2 = vector.extract_strided_slice %0 {offsets = [1, 0], sizes = [1, 16], strides = [1, 1]} : vector<9x32xf32> to vector<1x16xf32>
    %3 = vector.extract_strided_slice %0 {offsets = [2, 0], sizes = [1, 16], strides = [1, 1]} : vector<9x32xf32> to vector<1x16xf32>
    %4 = vector.extract_strided_slice %0 {offsets = [3, 0], sizes = [1, 16], strides = [1, 1]} : vector<9x32xf32> to vector<1x16xf32>
    %5 = vector.extract_strided_slice %0 {offsets = [4, 0], sizes = [1, 32], strides = [1, 1]} : vector<9x32xf32> to vector<1x32xf32>
    %6 = vector.extract_strided_slice %0 {offsets = [5, 0], sizes = [1, 32], strides = [1, 1]} : vector<9x32xf32> to vector<1x32xf32>
    %7 = vector.extract_strided_slice %0 {offsets = [6, 0], sizes = [1, 32], strides = [1, 1]} : vector<9x32xf32> to vector<1x32xf32>
    %8 = vector.extract_strided_slice %0 {offsets = [7, 0], sizes = [1, 32], strides = [1, 1]} : vector<9x32xf32> to vector<1x32xf32>
    %9 = vector.extract_strided_slice %0 {offsets = [8, 0], sizes = [1, 1], strides = [1, 1]} : vector<9x32xf32> to vector<1x1xf32>
    %c0_1 = arith.constant 0 : index
    %c0_2 = arith.constant 0 : index
    %10 = tpu.strided_load %arg0[%c0_1, %c0_2] {strides = array<i32: 2, 1>} : memref<128x4xf32, #tpu.memory_space<vmem>>, vector<32x4xf32>
    %c1 = arith.constant 1 : index
    %c0_3 = arith.constant 0 : index
    %11 = tpu.strided_load %arg0[%c1, %c0_3] {strides = array<i32: 2, 1>} : memref<128x4xf32, #tpu.memory_space<vmem>>, vector<32x4xf32>
    %12 = vector.extract_strided_slice %10 {offsets = [0, 0], sizes = [31, 4], strides = [1, 1]} : vector<32x4xf32> to vector<31x4xf32>
    %13 = vector.extract_strided_slice %11 {offsets = [0, 0], sizes = [31, 4], strides = [1, 1]} : vector<32x4xf32> to vector<31x4xf32>
    %14 = vector.extract_strided_slice %10 {offsets = [1, 0], sizes = [31, 4], strides = [1, 1]} : vector<32x4xf32> to vector<31x4xf32>
    %15 = vector.extract_strided_slice %11 {offsets = [1, 0], sizes = [31, 4], strides = [1, 1]} : vector<32x4xf32> to vector<31x4xf32>
    %16 = tpu.concatenate %12, %13, %14, %15 in 1 : vector<31x4xf32>, vector<31x4xf32>, vector<31x4xf32>, vector<31x4xf32> -> vector<31x16xf32>
    %c64 = arith.constant 64 : index
    %c0_4 = arith.constant 0 : index
    %17 = tpu.strided_load %arg0[%c64, %c0_4] {strides = array<i32: 2, 1>} : memref<128x4xf32, #tpu.memory_space<vmem>>, vector<32x4xf32>
    %c65 = arith.constant 65 : index
    %c0_5 = arith.constant 0 : index
    %18 = tpu.strided_load %arg0[%c65, %c0_5] {strides = array<i32: 2, 1>} : memref<128x4xf32, #tpu.memory_space<vmem>>, vector<32x4xf32>
    %19 = vector.extract_strided_slice %17 {offsets = [0, 0], sizes = [31, 4], strides = [1, 1]} : vector<32x4xf32> to vector<31x4xf32>
    %20 = vector.extract_strided_slice %18 {offsets = [0, 0], sizes = [31, 4], strides = [1, 1]} : vector<32x4xf32> to vector<31x4xf32>
    %21 = vector.extract_strided_slice %17 {offsets = [1, 0], sizes = [31, 4], strides = [1, 1]} : vector<32x4xf32> to vector<31x4xf32>
    %22 = vector.extract_strided_slice %18 {offsets = [1, 0], sizes = [31, 4], strides = [1, 1]} : vector<32x4xf32> to vector<31x4xf32>
    %23 = tpu.concatenate %19, %20, %21, %22 in 1 : vector<31x4xf32>, vector<31x4xf32>, vector<31x4xf32>, vector<31x4xf32> -> vector<31x16xf32>
    %24 = tpu.concatenate %16, %23 in 0 : vector<31x16xf32>, vector<31x16xf32> -> vector<62x16xf32>
    %c0_6 = arith.constant 0 : index
    %c0_7 = arith.constant 0 : index
    %25 = vector.load %arg1[%c0_6, %c0_7] : memref<16x8xf32, #tpu.memory_space<vmem>>, vector<16x8xf32>
    %cst = arith.constant dense<0.000000e+00> : vector<62x8xf32>
    %26 = tpu.matmul %24, %25, %cst {dimension_numbers = #tpu.dot_dimension_numbers<[1], [0], [0], [1], [0, 0, 1, 1], [], []>} : vector<62x16xf32>, vector<16x8xf32>, vector<62x8xf32> -> vector<62x8xf32>
    %27 = vector.broadcast %1 : vector<1x8xf32> to vector<62x8xf32>
    %28 = arith.addf %26, %27 : vector<62x8xf32>
    %cst_8 = arith.constant 0.000000e+00 : f32
    %29 = vector.broadcast %cst_8 : f32 to vector<62x8xf32>
    %30 = arith.cmpf ogt, %28, %29 : vector<62x8xf32>
    %cst_9 = arith.constant 2.000000e-01 : f32
    %31 = vector.broadcast %cst_9 : f32 to vector<62x8xf32>
    %32 = arith.mulf %31, %28 : vector<62x8xf32>
    %33 = arith.select %30, %28, %32 : vector<62x8xi1>, vector<62x8xf32>
    %c0_10 = arith.constant 0 : index
    %c0_11 = arith.constant 0 : index
    %34 = vector.load %arg6[%c0_10, %c0_11] : memref<62x8xf32, #tpu.memory_space<vmem>>, vector<62x8xf32>
    tpu.vector_store %arg6[%c0_10, %c0_11], %33 {strides = array<i32>} : memref<62x8xf32, #tpu.memory_space<vmem>>, vector<62x8xf32>,
    %c0_12 = arith.constant 0 : index
    %c0_13 = arith.constant 0 : index
    %35 = tpu.strided_load %arg6[%c0_12, %c0_13] {strides = array<i32: 2, 1>} : memref<62x8xf32, #tpu.memory_space<vmem>>, vector<15x8xf32>
    %c1_14 = arith.constant 1 : index
    %c0_15 = arith.constant 0 : index
    %36 = tpu.strided_load %arg6[%c1_14, %c0_15] {strides = array<i32: 2, 1>} : memref<62x8xf32, #tpu.memory_space<vmem>>, vector<15x8xf32>
    %37 = vector.extract_strided_slice %35 {offsets = [0, 0], sizes = [14, 8], strides = [1, 1]} : vector<15x8xf32> to vector<14x8xf32>
    %38 = vector.extract_strided_slice %36 {offsets = [0, 0], sizes = [14, 8], strides = [1, 1]} : vector<15x8xf32> to vector<14x8xf32>
    %39 = vector.extract_strided_slice %35 {offsets = [1, 0], sizes = [14, 8], strides = [1, 1]} : vector<15x8xf32> to vector<14x8xf32>
    %40 = vector.extract_strided_slice %36 {offsets = [1, 0], sizes = [14, 8], strides = [1, 1]} : vector<15x8xf32> to vector<14x8xf32>
    %41 = tpu.concatenate %37, %38, %39, %40 in 1 : vector<14x8xf32>, vector<14x8xf32>, vector<14x8xf32>, vector<14x8xf32> -> vector<14x32xf32>
    %c31 = arith.constant 31 : index
    %c0_16 = arith.constant 0 : index
    %42 = tpu.strided_load %arg6[%c31, %c0_16] {strides = array<i32: 2, 1>} : memref<62x8xf32, #tpu.memory_space<vmem>>, vector<15x8xf32>
    %c32 = arith.constant 32 : index
    %c0_17 = arith.constant 0 : index
    %43 = tpu.strided_load %arg6[%c32, %c0_17] {strides = array<i32: 2, 1>} : memref<62x8xf32, #tpu.memory_space<vmem>>, vector<15x8xf32>
    %44 = vector.extract_strided_slice %42 {offsets = [0, 0], sizes = [14, 8], strides = [1, 1]} : vector<15x8xf32> to vector<14x8xf32>
    %45 = vector.extract_strided_slice %43 {offsets = [0, 0], sizes = [14, 8], strides = [1, 1]} : vector<15x8xf32> to vector<14x8xf32>
    %46 = vector.extract_strided_slice %42 {offsets = [1, 0], sizes = [14, 8], strides = [1, 1]} : vector<15x8xf32> to vector<14x8xf32>
    %47 = vector.extract_strided_slice %43 {offsets = [1, 0], sizes = [14, 8], strides = [1, 1]} : vector<15x8xf32> to vector<14x8xf32>
    %48 = tpu.concatenate %44, %45, %46, %47 in 1 : vector<14x8xf32>, vector<14x8xf32>, vector<14x8xf32>, vector<14x8xf32> -> vector<14x32xf32>
    %49 = tpu.concatenate %41, %48 in 0 : vector<14x32xf32>, vector<14x32xf32> -> vector<28x32xf32>
    %c0_18 = arith.constant 0 : index
    %c0_19 = arith.constant 0 : index
    %50 = vector.load %arg2[%c0_18, %c0_19] : memref<32x16xf32, #tpu.memory_space<vmem>>, vector<32x16xf32>
    %cst_20 = arith.constant dense<0.000000e+00> : vector<28x16xf32>
    %51 = tpu.matmul %49, %50, %cst_20 {dimension_numbers = #tpu.dot_dimension_numbers<[1], [0], [0], [1], [0, 0, 1, 1], [], []>} : vector<28x32xf32>, vector<32x16xf32>, vector<28x16xf32> -> vector<28x16xf32>
    %52 = vector.broadcast %2 : vector<1x16xf32> to vector<28x16xf32>
    %53 = arith.addf %51, %52 : vector<28x16xf32>
    %cst_21 = arith.constant dense<0.000000e+00> : vector<16xf32>
    %54 = vector.multi_reduction <add>, %53, %cst_21 [0] : vector<28x16xf32> to vector<16xf32>
    %55 = vector.shape_cast %54 : vector<16xf32> to vector<1x16xf32>
    %cst_22 = arith.constant 2.800000e+01 : f32
    %56 = vector.broadcast %cst_22 : f32 to vector<1x16xf32>
    %57 = arith.divf %55, %56 : vector<1x16xf32>
    %58 = vector.broadcast %57 : vector<1x16xf32> to vector<28x16xf32>
    %59 = arith.subf %53, %58 : vector<28x16xf32>
    %60 = arith.mulf %59, %59 : vector<28x16xf32>
    %cst_23 = arith.constant dense<0.000000e+00> : vector<16xf32>
    %61 = vector.multi_reduction <add>, %60, %cst_23 [0] : vector<28x16xf32> to vector<16xf32>
    %62 = vector.shape_cast %61 : vector<16xf32> to vector<1x16xf32>
    %cst_24 = arith.constant 2.800000e+01 : f32
    %63 = vector.broadcast %cst_24 : f32 to vector<1x16xf32>
    %64 = arith.divf %62, %63 : vector<1x16xf32>
    %65 = vector.broadcast %57 : vector<1x16xf32> to vector<28x16xf32>
    %66 = arith.subf %53, %65 : vector<28x16xf32>
    %cst_25 = arith.constant 9.99999974E-6 : f32
    %67 = vector.broadcast %cst_25 : f32 to vector<1x16xf32>
    %68 = arith.addf %64, %67 : vector<1x16xf32>
    %69 = math.rsqrt %68 : vector<1x16xf32>
    %70 = vector.broadcast %69 : vector<1x16xf32> to vector<28x16xf32>
    %71 = arith.mulf %66, %70 : vector<28x16xf32>
    %72 = vector.broadcast %3 : vector<1x16xf32> to vector<28x16xf32>
    %73 = arith.mulf %71, %72 : vector<28x16xf32>
    %74 = vector.broadcast %4 : vector<1x16xf32> to vector<28x16xf32>
    %75 = arith.addf %73, %74 : vector<28x16xf32>
    %cst_26 = arith.constant 0.000000e+00 : f32
    %76 = vector.broadcast %cst_26 : f32 to vector<28x16xf32>
    %77 = arith.cmpf ogt, %75, %76 : vector<28x16xf32>
    %cst_27 = arith.constant 2.000000e-01 : f32
    %78 = vector.broadcast %cst_27 : f32 to vector<28x16xf32>
    %79 = arith.mulf %78, %75 : vector<28x16xf32>
    %80 = arith.select %77, %75, %79 : vector<28x16xi1>, vector<28x16xf32>
    %c0_28 = arith.constant 0 : index
    %c0_29 = arith.constant 0 : index
    %81 = vector.load %arg7[%c0_28, %c0_29] : memref<28x16xf32, #tpu.memory_space<vmem>>, vector<28x16xf32>
    tpu.vector_store %arg7[%c0_28, %c0_29], %80 {strides = array<i32>} : memref<28x16xf32, #tpu.memory_space<vmem>>, vector<28x16xf32>,
    %c0_30 = arith.constant 0 : index
    %c0_31 = arith.constant 0 : index
    %82 = tpu.strided_load %arg7[%c0_30, %c0_31] {strides = array<i32: 2, 1>} : memref<28x16xf32, #tpu.memory_space<vmem>>, vector<7x16xf32>
    %c1_32 = arith.constant 1 : index
    %c0_33 = arith.constant 0 : index
    %83 = tpu.strided_load %arg7[%c1_32, %c0_33] {strides = array<i32: 2, 1>} : memref<28x16xf32, #tpu.memory_space<vmem>>, vector<7x16xf32>
    %84 = vector.extract_strided_slice %82 {offsets = [0, 0], sizes = [6, 16], strides = [1, 1]} : vector<7x16xf32> to vector<6x16xf32>
    %85 = vector.extract_strided_slice %83 {offsets = [0, 0], sizes = [6, 16], strides = [1, 1]} : vector<7x16xf32> to vector<6x16xf32>
    %86 = vector.extract_strided_slice %82 {offsets = [1, 0], sizes = [6, 16], strides = [1, 1]} : vector<7x16xf32> to vector<6x16xf32>
    %87 = vector.extract_strided_slice %83 {offsets = [1, 0], sizes = [6, 16], strides = [1, 1]} : vector<7x16xf32> to vector<6x16xf32>
    %88 = tpu.concatenate %84, %85, %86, %87 in 1 : vector<6x16xf32>, vector<6x16xf32>, vector<6x16xf32>, vector<6x16xf32> -> vector<6x64xf32>
    %c14 = arith.constant 14 : index
    %c0_34 = arith.constant 0 : index
    %89 = tpu.strided_load %arg7[%c14, %c0_34] {strides = array<i32: 2, 1>} : memref<28x16xf32, #tpu.memory_space<vmem>>, vector<7x16xf32>
    %c15 = arith.constant 15 : index
    %c0_35 = arith.constant 0 : index
    %90 = tpu.strided_load %arg7[%c15, %c0_35] {strides = array<i32: 2, 1>} : memref<28x16xf32, #tpu.memory_space<vmem>>, vector<7x16xf32>
    %91 = vector.extract_strided_slice %89 {offsets = [0, 0], sizes = [6, 16], strides = [1, 1]} : vector<7x16xf32> to vector<6x16xf32>
    %92 = vector.extract_strided_slice %90 {offsets = [0, 0], sizes = [6, 16], strides = [1, 1]} : vector<7x16xf32> to vector<6x16xf32>
    %93 = vector.extract_strided_slice %89 {offsets = [1, 0], sizes = [6, 16], strides = [1, 1]} : vector<7x16xf32> to vector<6x16xf32>
    %94 = vector.extract_strided_slice %90 {offsets = [1, 0], sizes = [6, 16], strides = [1, 1]} : vector<7x16xf32> to vector<6x16xf32>
    %95 = tpu.concatenate %91, %92, %93, %94 in 1 : vector<6x16xf32>, vector<6x16xf32>, vector<6x16xf32>, vector<6x16xf32> -> vector<6x64xf32>
    %96 = tpu.concatenate %88, %95 in 0 : vector<6x64xf32>, vector<6x64xf32> -> vector<12x64xf32>
    %c0_36 = arith.constant 0 : index
    %c0_37 = arith.constant 0 : index
    %97 = vector.load %arg3[%c0_36, %c0_37] : memref<64x32xf32, #tpu.memory_space<vmem>>, vector<64x32xf32>
    %cst_38 = arith.constant dense<0.000000e+00> : vector<12x32xf32>
    %98 = tpu.matmul %96, %97, %cst_38 {dimension_numbers = #tpu.dot_dimension_numbers<[1], [0], [0], [1], [0, 0, 1, 1], [], []>} : vector<12x64xf32>, vector<64x32xf32>, vector<12x32xf32> -> vector<12x32xf32>
    %99 = vector.broadcast %5 : vector<1x32xf32> to vector<12x32xf32>
    %100 = arith.addf %98, %99 : vector<12x32xf32>
    %cst_39 = arith.constant dense<0.000000e+00> : vector<32xf32>
    %101 = vector.multi_reduction <add>, %100, %cst_39 [0] : vector<12x32xf32> to vector<32xf32>
    %102 = vector.shape_cast %101 : vector<32xf32> to vector<1x32xf32>
    %cst_40 = arith.constant 1.200000e+01 : f32
    %103 = vector.broadcast %cst_40 : f32 to vector<1x32xf32>
    %104 = arith.divf %102, %103 : vector<1x32xf32>
    %105 = vector.broadcast %104 : vector<1x32xf32> to vector<12x32xf32>
    %106 = arith.subf %100, %105 : vector<12x32xf32>
    %107 = arith.mulf %106, %106 : vector<12x32xf32>
    %cst_41 = arith.constant dense<0.000000e+00> : vector<32xf32>
    %108 = vector.multi_reduction <add>, %107, %cst_41 [0] : vector<12x32xf32> to vector<32xf32>
    %109 = vector.shape_cast %108 : vector<32xf32> to vector<1x32xf32>
    %cst_42 = arith.constant 1.200000e+01 : f32
    %110 = vector.broadcast %cst_42 : f32 to vector<1x32xf32>
    %111 = arith.divf %109, %110 : vector<1x32xf32>
    %112 = vector.broadcast %104 : vector<1x32xf32> to vector<12x32xf32>
    %113 = arith.subf %100, %112 : vector<12x32xf32>
    %cst_43 = arith.constant 9.99999974E-6 : f32
    %114 = vector.broadcast %cst_43 : f32 to vector<1x32xf32>
    %115 = arith.addf %111, %114 : vector<1x32xf32>
    %116 = math.rsqrt %115 : vector<1x32xf32>
    %117 = vector.broadcast %116 : vector<1x32xf32> to vector<12x32xf32>
    %118 = arith.mulf %113, %117 : vector<12x32xf32>
    %119 = vector.broadcast %6 : vector<1x32xf32> to vector<12x32xf32>
    %120 = arith.mulf %118, %119 : vector<12x32xf32>
    %121 = vector.broadcast %7 : vector<1x32xf32> to vector<12x32xf32>
    %122 = arith.addf %120, %121 : vector<12x32xf32>
    %cst_44 = arith.constant 0.000000e+00 : f32
    %123 = vector.broadcast %cst_44 : f32 to vector<12x32xf32>
    %124 = arith.cmpf ogt, %122, %123 : vector<12x32xf32>
    %cst_45 = arith.constant 2.000000e-01 : f32
    %125 = vector.broadcast %cst_45 : f32 to vector<12x32xf32>
    %126 = arith.mulf %125, %122 : vector<12x32xf32>
    %127 = arith.select %124, %122, %126 : vector<12x32xi1>, vector<12x32xf32>
    %128 = vector.broadcast %8 : vector<1x32xf32> to vector<12x32xf32>
    %129 = arith.mulf %127, %128 : vector<12x32xf32>
    %cst_46 = arith.constant dense<0.000000e+00> : vector<12xf32>
    %130 = vector.multi_reduction <add>, %129, %cst_46 [1] : vector<12x32xf32> to vector<12xf32>
    %131 = vector.shape_cast %130 : vector<12xf32> to vector<12x1xf32>
    %132 = vector.broadcast %9 : vector<1x1xf32> to vector<12x1xf32>
    %133 = arith.addf %131, %132 : vector<12x1xf32>
    %134 = arith.negf %133 : vector<12x1xf32>
    %135 = math.exp %134 : vector<12x1xf32>
    %cst_47 = arith.constant 1.000000e+00 : f32
    %136 = vector.broadcast %cst_47 : f32 to vector<12x1xf32>
    %137 = arith.addf %136, %135 : vector<12x1xf32>
    %138 = arith.divf %136, %137 : vector<12x1xf32>
    %c0_48 = arith.constant 0 : index
    %c0_49 = arith.constant 0 : index
    %139 = vector.load %arg5[%c0_48, %c0_49] : memref<12x1xf32, #tpu.memory_space<vmem>>, vector<12x1xf32>
    tpu.vector_store %arg5[%c0_48, %c0_49], %138 {strides = array<i32>} : memref<12x1xf32, #tpu.memory_space<vmem>>, vector<12x1xf32>,
    return
  }
}

</mosaic_0001>

<bundles_post_ra>
// kernel: tpu_custom_call.1
= control target key start
LH: loop header
LB: loop body
LE: loop exit
PB: predicated region body
PF: predicated region fallthrough
CT: control target
= control target key end

     0   :  { %vm57_vm0 = vcmask 1046528   ;;  %s786_s24 = smov 4   ;;  %s787_s29 = smov 8   ;;  %vm96_vm1 = vcmask 31744   ;;  %vm101_vm2 = vcmask 64512   ;;  %vm106_vm3 = vcmask 97280   ;;  %s1103_s0 = inlined_call_operand.vmem [shape: f32[128,4], index: 0, kind: input, shape index: {}]   ;;  %s1104_s4 = inlined_call_operand.vmem [shape: f32[9,32], index: 4, kind: input, shape index: {}]   ;;  %s1105_s1 = inlined_call_operand.vmem [shape: f32[16,8], index: 1, kind: input, shape index: {}]   ;;  %s1106_s2 = inlined_call_operand.vmem [shape: f32[32,16], index: 2, kind: input, shape index: {}]   ;;  %s1107_s3 = inlined_call_operand.vmem [shape: f32[64,32], index: 3, kind: input, shape index: {}]   ;;  %s1108_s5 = inlined_call_operand.vmem [shape: f32[12,1], index: 5, kind: output, shape index: {}]  }
   0x1   :  { %v738_v0 = vld [vmem:[%s1103_s0 + $0x41] ss:$2 sm:$0xff]  ;;  %v831_v1 = vld [vmem:[%s1103_s0 + $0x40] ss:$2 sm:$0xff]  ;;  %v836_v2 = vld [vmem:[%s1103_s0 + $0x50] ss:$2 sm:$0xff] }
   0x2   :  { %131 = vrot.lane.b32.xlu0 %v738_v0, %s786_s24  ;;  %v166_v3 = vrot.slane %v738_v0, 1  ;;  %v147_v4 = vrot.slane %v831_v1, 1  ;;  %v148_v5 = vrot.slane %v836_v2, 1  ;;  %v739_v6 = vld [vmem:[%s1103_s0 + $0x51] ss:$2 sm:$0xff]  ;;  %s788_s7 = smov 12  }
   0x3   :  { %v167_v7 = vrot.slane %v739_v6, 1  ;;  %v847_v8 = vld [vmem:[%s1103_s0 + $0x60] ss:$2 sm:$0xff]  ;;  %v740_v12 = vld [vmem:[%s1103_s0 + $0x61] ss:$2 sm:$0xff]  ;;  %vm213_vm4 = vcmask 130048  }
   0x4   :  { %v149_v9 = vsel %vm57_vm0, %v147_v4, %v148_v5  ;;  %v150_v11 = vrot.slane %v847_v8, 1  ;;  %v169_v13 = vrot.slane %v740_v12, 1  ;;  %v862_v15 = vld [vmem:[%s1103_s0] ss:$2 sm:$0xff]  ;;  %v867_v16 = vld [vmem:[%s1103_s0 + $0x10] ss:$2 sm:$0xff] }
   0x5   :  { %154 = vrot.lane.b32.xlu1 %v149_v9, %s787_s29  ;;  %v168_v10 = vsel %vm57_vm0, %v166_v3, %v167_v7  ;;  %v730_v18 = vld [vmem:[%s1103_s0 + $0x1] ss:$2 sm:$0xff]  ;;  %v58_v19 = vrot.slane %v862_v15, 1  ;;  %v59_v20 = vrot.slane %v867_v16, 1  ;;  %v731_v21 = vld [vmem:[%s1103_s0 + $0x11] ss:$2 sm:$0xff] }
   0x6   :  { %173 = vrot.lane.b32.xlu2 %v168_v10, %s788_s7  ;;  %v151_v14 = vsel %vm57_vm0, %v148_v5, %v150_v11  ;;  %v170_v17 = vsel %vm57_vm0, %v167_v7, %v169_v13  ;;  %v77_v22 = vrot.slane %v730_v18, 1  ;;  %v78_v23 = vrot.slane %v731_v21, 1  ;;  %v885_v25 = vld [vmem:[%s1103_s0 + $0x70] ss:$2 sm:$0xff]  ;;  %v741_v28 = vld [vmem:[%s1103_s0 + $0x71] ss:$2 sm:$0xff] }
   0x7   :  { %v60_v24 = vsel %vm57_vm0, %v58_v19, %v59_v20  ;;  %v152_v27 = vrot.slane %v885_v25, 1  ;;  %v171_v29 = vrot.slane %v741_v28, 1  ;;  %v899_v31 = vld [vmem:[%s1103_s0 + $0x20] ss:$2 sm:$0xff]  ;;  %v732_v34 = vld [vmem:[%s1103_s0 + $0x21] ss:$2 sm:$0xff] }
   0x8   :  { %v79_v26 = vsel %vm57_vm0, %v77_v22, %v78_v23  ;;  %v61_v33 = vrot.slane %v899_v31, 1  ;;  %v80_v35 = vrot.slane %v732_v34, 1  ;;  %v917_v38 = vld [vmem:[%s1103_s0 + $0x30] ss:$2 sm:$0xff]  ;;  %v733_v40 = vld [vmem:[%s1103_s0 + $0x31] ss:$2 sm:$0xff] }
   0x9   :  { %v153_v30 = vsel %vm57_vm0, %v150_v11, %v152_v27  ;;  %v172_v32 = vsel %vm57_vm0, %v169_v13, %v171_v29  ;;  %v63_v39 = vrot.slane %v917_v38, 1  ;;  %v82_v41 = vrot.slane %v733_v40, 1  ;;  %v211_v44 = vld [vmem:[%s1105_s1 + $0x8] sm:$0xff]  ;;  %v210_v45 = vld [vmem:[%s1105_s1] sm:$0xff]  ;;  %s790_s9 = smov 24   ;;  %s793_s17 = smov 48  }
   0xa   :  { %133 = vrot.lane.b32.xlu0 %v739_v6, %s786_s24  ;;  %v62_v36 = vsel %vm57_vm0, %v59_v20, %v61_v33  ;;  %v81_v37 = vsel %vm57_vm0, %v78_v23, %v80_v35  ;;  %758 = vmatpush.msra.mxu3 %v211_v44  ;;  %vm306_vm13 = vcmask 62464   ;;  %vm405_vm14 = vcmask 261120  }
   0xb   :  { %v64_v42 = vsel %vm57_vm0, %v61_v33, %v63_v39  ;;  %v83_v43 = vsel %vm57_vm0, %v80_v35, %v82_v41  ;;  %248 = vmatpush.msra.mxu0 %v211_v44  ;;  %vm347_vm15 = vcmask 195584  }
   0xc   :  { %759 = vmatpush.msra.mxu3 %v210_v45 }
   0xd   :  { %156 = vrot.lane.b32.xlu1 %v151_v14, %s787_s29  ;;  %249 = vmatpush.msra.mxu0 %v210_v45 }
   0xe   :  { %175 = vrot.lane.b32.xlu2 %v170_v17, %s788_s7 }
  0x12   :  { %41 = vrot.lane.b32.xlu0 %v730_v18, %s786_s24 }
  0x15   :  { %65 = vrot.lane.b32.xlu1 %v60_v24, %s787_s29 }
  0x16   :  { %84 = vrot.lane.b32.xlu2 %v79_v26, %s788_s7 }
  0x1a   :  { %135 = vrot.lane.b32.xlu0 %v740_v12, %s786_s24 }
  0x1d   :  { %158 = vrot.lane.b32.xlu1 %v153_v30, %s787_s29 }
  0x1e   :  { %177 = vrot.lane.b32.xlu2 %v172_v32, %s788_s7 }
  0x22   :  { %43 = vrot.lane.b32.xlu0 %v731_v21, %s786_s24 }
  0x25   :  { %67 = vrot.lane.b32.xlu1 %v62_v36, %s787_s29 }
  0x26   :  { %86 = vrot.lane.b32.xlu2 %v81_v37, %s788_s7 }
  0x2a   :  { %137 = vrot.lane.b32.xlu0 %v741_v28, %s786_s24 }
  0x2d   :  { %160 = vrot.lane.b32.xlu1 %v152_v27, %s787_s29 }
  0x2e   :  { %179 = vrot.lane.b32.xlu2 %v171_v29, %s788_s7 }
  0x32   :  { %45 = vrot.lane.b32.xlu0 %v732_v34, %s786_s24 }
  0x35   :  { %69 = vrot.lane.b32.xlu1 %v64_v42, %s787_s29 }
  0x36   :  { %88 = vrot.lane.b32.xlu2 %v83_v43, %s788_s7 }
  0x3a   :  { %47 = vrot.lane.b32.xlu0 %v733_v40, %s786_s24 }
  0x3d   :  { %71 = vrot.lane.b32.xlu1 %v63_v39, %s787_s29  ;;  %v986_v39 = vld [vmem:[%s1104_s4] sm:$0xff] }
  0x3e   :  { %90 = vrot.lane.b32.xlu2 %v82_v41, %s788_s7  ;;  %v212_v40 = vperm.slane %v986_v39, 0  ;;  %s789_s7 = smov 16  }
  0x60   :  { %v174_v46 = vpop.permute.xlu2 %173 }
  0x68   :  { %v176_v47 = vpop.permute.xlu2 %175 }
  0x70   :  { %v85_v53 = vpop.permute.xlu2 %84 }
  0x74   :  { %v132_v48 = vpop.permute.xlu0 %131 }
  0x75   :  { %v185_v50 = vsel %vm96_vm1, %v831_v1, %v132_v48 }
  0x77   :  { %v155_v49 = vpop.permute.xlu1 %154 }
  0x78   :  { %v189_v51 = vsel %vm101_vm2, %v185_v50, %v155_v49  ;;  %v178_v0 = vpop.permute.xlu2 %177 }
  0x79   :  { %v193_v55 = vsel %vm106_vm3, %v189_v51, %v174_v46 }
  0x7a   :  { %v201_v59 = vrot.slane %v193_v55, 1 }
  0x7c   :  { %v134_v52 = vpop.permute.xlu0 %133 }
  0x7d   :  { %v186_v54 = vsel %vm96_vm1, %v836_v2, %v134_v52 }
  0x7f   :  { %v157_v56 = vpop.permute.xlu1 %156 }
  0x80   :  { %v190_v57 = vsel %vm101_vm2, %v186_v54, %v157_v56  ;;  %v87_v9 = vpop.permute.xlu2 %86 }
  0x81   :  { %v194_v58 = vsel %vm106_vm3, %v190_v57, %v176_v47 }
  0x82   :  { %v202_v60 = vrot.slane %v194_v58, 1 }
  0x84   :  { %v203_v61 = vsel %vm57_vm0, %v201_v59, %v202_v60  ;;  %v42_v62 = vpop.permute.xlu0 %41 }
  0x85   :  { %746 = vmatmul.msk.f32.vlgmr.msra.gmra.mxu3 %vm213_vm4, %v203_v61  ;;  %v97_v63 = vsel %vm96_vm1, %v862_v15, %v42_v62 }
  0x87   :  { %v66_v1 = vpop.permute.xlu1 %65 }
  0x88   :  { %v102_v2 = vsel %vm101_vm2, %v97_v63, %v66_v1  ;;  %v180_v18 = vpop.permute.xlu2 %179 }
  0x89   :  { %v107_v3 = vsel %vm106_vm3, %v102_v2, %v85_v53 }
  0x8a   :  { %742 = vmatmul.msk.f32.vlgmr.msra.gmra.mxu0 %vm213_vm4, %v107_v3 }
  0x8c   :  { %v136_v4 = vpop.permute.xlu0 %135 }
  0x8d   :  { %v187_v5 = vsel %vm96_vm1, %v847_v8, %v136_v4 }
  0x8f   :  { %v159_v6 = vpop.permute.xlu1 %158 }
  0x90   :  { %v191_v7 = vsel %vm101_vm2, %v187_v5, %v159_v6  ;;  %v89_v27 = vpop.permute.xlu2 %88 }
  0x91   :  { %v195_v10 = vsel %vm106_vm3, %v191_v7, %v178_v0 }
  0x92   :  { %v204_v11 = vrot.slane %v195_v10, 1 }
  0x94   :  { %v205_v12 = vsel %vm57_vm0, %v202_v60, %v204_v11  ;;  %v44_v13 = vpop.permute.xlu0 %43 }
  0x95   :  { %747 = vmatmul.msk.f32.gmra.mxu3 %vm213_vm4, %v205_v12  ;;  %v98_v14 = vsel %vm96_vm1, %v867_v16, %v44_v13 }
  0x97   :  { %v68_v15 = vpop.permute.xlu1 %67 }
  0x98   :  { %v103_v17 = vsel %vm101_vm2, %v98_v14, %v68_v15  ;;  %v91_v34 = vpop.permute.xlu2 %90 }
  0x99   :  { %v108_v8 = vsel %vm106_vm3, %v103_v17, %v87_v9 }
  0x9a   :  { %743 = vmatmul.msk.f32.gmra.mxu0 %vm213_vm4, %v108_v8 }
  0x9c   :  { %v138_v19 = vpop.permute.xlu0 %137 }
  0x9d   :  { %v188_v20 = vsel %vm96_vm1, %v885_v25, %v138_v19 }
  0x9f   :  { %v161_v21 = vpop.permute.xlu1 %160 }
  0xa0   :  { %v192_v22 = vsel %vm101_vm2, %v188_v20, %v161_v21 }
  0xa1   :  { %v196_v23 = vsel %vm106_vm3, %v192_v22, %v180_v18 }
  0xa2   :  { %v206_v24 = vrot.slane %v196_v23, 1 }
  0xa4   :  { %v207_v16 = vsel %vm57_vm0, %v204_v11, %v206_v24  ;;  %v46_v26 = vpop.permute.xlu0 %45 }
  0xa5   :  { %748 = vmatmul.msk.f32.gmra.mxu3 %vm213_vm4, %v207_v16  ;;  %v99_v28 = vsel %vm96_vm1, %v899_v31, %v46_v26 }
  0xa7   :  { %v70_v29 = vpop.permute.xlu1 %69 }
  0xa8   :  { %v104_v30 = vsel %vm101_vm2, %v99_v28, %v70_v29  ;;  %v403_v29 = vld [vmem:[%s1106_s2 + $0x18] sm:$0xff] }
  0xa9   :  { %v109_v25 = vsel %vm106_vm3, %v104_v30, %v89_v27  ;;  %v402_v30 = vld [vmem:[%s1106_s2 + $0x10] sm:$0xff]  ;;  %428 = vmatpush.msra.mxu1 %v403_v29 }
  0xaa   :  { %744 = vmatmul.msk.f32.gmra.mxu0 %vm213_vm4, %v109_v25  ;;  %v401_v25 = vld [vmem:[%s1106_s2 + $0x8] sm:$0xff] }
  0xab   :  { %429 = vmatpush.msra.mxu1 %v402_v30 }
  0xac   :  { %v48_v32 = vpop.permute.xlu0 %47 }
  0xad   :  { %749 = vmatmul.msk.f32.gmra.mxu3 %vm213_vm4, %v206_v24  ;;  %v100_v33 = vsel %vm96_vm1, %v917_v38, %v48_v32  ;;  %430 = vmatpush.msra.mxu1 %v401_v25  ;;  %v400_v32 = vld [vmem:[%s1106_s2] sm:$0xff]  ;;  %vm450_vm1 = vcmask 125952   ;;  %s792_s2 = smov 32  }
  0xaf   :  { %v72_v35 = vpop.permute.xlu1 %71  ;;  %431 = vmatpush.msra.mxu1 %v400_v32 }
  0xb0   :  { %v105_v36 = vsel %vm101_vm2, %v100_v33, %v72_v35 }
  0xb1   :  { %v110_v37 = vsel %vm106_vm3, %v105_v36, %v91_v34 }
  0xb2   :  { %v209_v31 = vsel %vm57_vm0, %v110_v37, %v201_v59 }
  0xb3   :  { %745 = vmatmul.msk.f32.gmra.mxu0 %vm213_vm4, %v209_v31 }
 0x107   :  { %v251_v41 = vpop.f32.mrf.mxu0 }
 0x108   :  { %v252_v42 = vadd.f32 %v251_v41, %v212_v40  ;;  %v263_v38 = vpop.f32.mrf.mxu3 }
 0x109   :  { %v264_v43 = vadd.f32 %v263_v38, %v212_v40 }
 0x10a   :  { %vm275_vm5 = vcmp.gt.f32.partialorder %v252_v42, 0.0  ;;  %v283_v44 = vmul.f32 0.2, %v252_v42 }
 0x10b   :  { %vm279_vm6 = vcmp.gt.f32.partialorder %v264_v43, 0.0  ;;  %v287_v45 = vmul.f32 0.2, %v264_v43 }
 0x10c   :  { %v291_v46 = vsel %vm275_vm5, %v252_v42, %v283_v44 }
 0x10d   :  { %299 = vst.msk [vmem:[#allocation2] sm:$0xff] %vm101_vm2, %v291_v46  ;;  %v295_v47 = vsel %vm279_vm6, %v264_v43, %v287_v45 }
 0x10e   :  { %303 = vst.msk [vmem:[#allocation2 + $0x20] sm:$0xff] %vm101_vm2, %v295_v47 }
 0x117   :  { %v254_v48 = vpop.f32.mrf.mxu0 }
 0x118   :  { %v255_v49 = vadd.f32 %v254_v48, %v212_v40  ;;  %v266_v50 = vpop.f32.mrf.mxu3 }
 0x119   :  { %v267_v51 = vadd.f32 %v266_v50, %v212_v40 }
 0x11a   :  { %vm276_vm7 = vcmp.gt.f32.partialorder %v255_v49, 0.0  ;;  %v284_v52 = vmul.f32 0.2, %v255_v49 }
 0x11b   :  { %vm280_vm8 = vcmp.gt.f32.partialorder %v267_v51, 0.0  ;;  %v288_v53 = vmul.f32 0.2, %v267_v51 }
 0x11c   :  { %v292_v54 = vsel %vm276_vm7, %v255_v49, %v284_v52 }
 0x11d   :  { %300 = vst.msk [vmem:[#allocation2 + $0x8] sm:$0xff] %vm101_vm2, %v292_v54  ;;  %v296_v55 = vsel %vm280_vm8, %v267_v51, %v288_v53 }
 0x11e   :  { %304 = vst.msk [vmem:[#allocation2 + $0x28] sm:$0xff] %vm101_vm2, %v296_v55 }
 0x124   :  { %v312_v56 = vld [vmem:[#allocation2 + $0x1] ss:$2 sm:$0xff]  ;;  %v308_v19 = vld [vmem:[#allocation2] ss:$2 sm:$0xff] }
 0x125   :  { %317 = vrot.lane.b32.xlu0 %v312_v56, %s787_s29  ;;  %v355_v0 = vld [vmem:[#allocation2 + $0x20] ss:$2 sm:$0xff]  ;;  %v334_v20 = vrot.slane %v312_v56, 1  ;;  %v325_v22 = vrot.slane %v308_v19, 1 }
 0x126   :  { %v377_v15 = vrot.slane %v355_v0, 1 }
 0x127   :  { %v257_v57 = vpop.f32.mrf.mxu0 }
 0x128   :  { %v258_v58 = vadd.f32 %v257_v57, %v212_v40  ;;  %v269_v59 = vpop.f32.mrf.mxu3 }
 0x129   :  { %v270_v60 = vadd.f32 %v269_v59, %v212_v40 }
 0x12a   :  { %vm277_vm9 = vcmp.gt.f32.partialorder %v258_v58, 0.0  ;;  %v285_v61 = vmul.f32 0.2, %v258_v58 }
 0x12b   :  { %vm281_vm10 = vcmp.gt.f32.partialorder %v270_v60, 0.0  ;;  %v289_v62 = vmul.f32 0.2, %v270_v60 }
 0x12c   :  { %v293_v63 = vsel %vm277_vm9, %v258_v58, %v285_v61 }
 0x12d   :  { %301 = vst.msk [vmem:[#allocation2 + $0x10] sm:$0xff] %vm101_vm2, %v293_v63  ;;  %v297_v1 = vsel %vm281_vm10, %v270_v60, %v289_v62  ;;  %360 = vrot.lane.b32.xlu0 %v355_v0, %s787_s29  ;;  %v791_v63 = vmov 28.0   ;;  %v404_v0 = vperm.slane %v986_v39, 1 }
 0x12e   :  { %305 = vst.msk [vmem:[#allocation2 + $0x30] sm:$0xff] %vm101_vm2, %v297_v1  ;;  %770 = vrcp.f32 %v791_v63 }
 0x130   :  { %v260_v2 = vpop.f32.mrf.mxu0  ;;  %v272_v3 = vpop.f32.mrf.mxu3 }
 0x131   :  { %v261_v4 = vadd.f32 %v260_v2, %v212_v40  ;;  %v273_v5 = vadd.f32 %v272_v3, %v212_v40 }
 0x133   :  { %vm278_vm11 = vcmp.gt.f32.partialorder %v261_v4, 0.0  ;;  %v286_v6 = vmul.f32 0.2, %v261_v4  ;;  %vm282_vm12 = vcmp.gt.f32.partialorder %v273_v5, 0.0  ;;  %v290_v7 = vmul.f32 0.2, %v273_v5 }
 0x135   :  { %v294_v9 = vsel %vm278_vm11, %v261_v4, %v286_v6  ;;  %v298_v10 = vsel %vm282_vm12, %v273_v5, %v290_v7  ;;  %v771_v5 = vpop.eup %770  ;;  %vm548_vm11 = vcmask 392192   ;;  %vm583_vm12 = vcmask 523264  }
 0x136   :  { %302 = vst.msk [vmem:[#allocation2 + $0x18] sm:$0xff] %vm101_vm2, %v294_v9 }
 0x137   :  { %307 = vst.msk [vmem:[#allocation2 + $0x38] sm:$0x3f] %vm306_vm13, %v298_v10  ;;  %v460_v10 = vmul.f32 28.0, %v771_v5 }
 0x13d   :  { %v314_v11 = vld [vmem:[#allocation2 + $0x11] ss:$2 sm:$0x7f]  ;;  %v310_v12 = vld [vmem:[#allocation2 + $0x10] ss:$2 sm:$0x7f] }
 0x13e   :  { %319 = vrot.lane.b32.xlu2 %v314_v11, %s787_s29  ;;  %v326_v13 = vrot.slane %v310_v12, 1  ;;  %v357_v14 = vld [vmem:[#allocation2 + $0x30] ss:$2 sm:$0x7f]  ;;  %v335_v8 = vrot.slane %v314_v11, 1 }
 0x13f   :  { %v378_v17 = vrot.slane %v357_v14, 1  ;;  %v351_v24 = vld [vmem:[#allocation2 + $0x1f] ss:$2 sm:$0xff]  ;;  %v353_v16 = vld [vmem:[#allocation2 + $0x2f] ss:$2 sm:$0x7f] }
 0x140   :  { %330 = vrot.lane.b32.xlu1 %v326_v13, %s789_s7  ;;  %v336_v21 = vsel %vm57_vm0, %v334_v20, %v335_v8  ;;  %v327_v23 = vsel %vm57_vm0, %v325_v22, %v326_v13  ;;  %v368_v26 = vrot.slane %v351_v24, 1  ;;  %v369_v27 = vrot.slane %v353_v16, 1 }
 0x141   :  { %v379_v18 = vsel %vm57_vm0, %v377_v15, %v378_v17 }
 0x142   :  { %380 = vrot.lane.b32.xlu0 %v379_v18, %s790_s9  ;;  %v370_v28 = vsel %vm57_vm0, %v368_v26, %v369_v27  ;;  %vm394_vm0 = vcmask 1045504  }
 0x146   :  { %337 = vrot.lane.b32.xlu2 %v336_v21, %s790_s9 }
 0x148   :  { %328 = vrot.lane.b32.xlu1 %v327_v23, %s789_s7 }
 0x14a   :  { %362 = vrot.lane.b32.xlu0 %v357_v14, %s787_s29 }
 0x14e   :  { %339 = vrot.lane.b32.xlu2 %v335_v8, %s790_s9 }
 0x150   :  { %371 = vrot.lane.b32.xlu1 %v370_v28, %s789_s7 }
 0x156   :  { %382 = vrot.lane.b32.xlu2 %v378_v17, %s790_s9  ;;  %v461_v17 = vsub.f32 1.0, %v460_v10 }
 0x158   :  { %373 = vrot.lane.b32.xlu1 %v369_v27, %s789_s7 }
 0x197   :  { %v318_v33 = vpop.permute.xlu0 %317 }
 0x198   :  { %v320_v34 = vpop.permute.xlu2 %319  ;;  %v343_v31 = vsel %vm101_vm2, %v308_v19, %v318_v33  ;;  %v462_v19 = vmul.f32 %v771_v5, %v461_v17 }
 0x199   :  { %v344_v44 = vsel %vm101_vm2, %v310_v12, %v320_v34 }
 0x19a   :  { %v463_v22 = vadd.f32 %v771_v5, %v462_v19 }
 0x19f   :  { %v361_v36 = vpop.permute.xlu0 %360 }
 0x1a0   :  { %v338_v37 = vpop.permute.xlu2 %337  ;;  %v386_v45 = vsel %vm101_vm2, %v351_v24, %v361_v36 }
 0x1a8   :  { %v340_v43 = vpop.permute.xlu2 %339 }
 0x1b0   :  { %v383_v56 = vpop.permute.xlu2 %382 }
 0x1b2   :  { %v331_v35 = vpop.permute.xlu1 %330 }
 0x1b3   :  { %v346_v47 = vsel %vm213_vm4, %v344_v44, %v331_v35 }
 0x1b4   :  { %v381_v38 = vpop.permute.xlu0 %380  ;;  %v349_v51 = vsel %vm347_vm15, %v346_v47, %v340_v43 }
 0x1ba   :  { %v329_v40 = vpop.permute.xlu1 %328 }
 0x1bb   :  { %v345_v41 = vsel %vm213_vm4, %v343_v31, %v329_v40 }
 0x1bc   :  { %v348_v42 = vsel %vm347_vm15, %v345_v41, %v338_v37  ;;  %v363_v52 = vpop.permute.xlu0 %362 }
 0x1bd   :  { %750 = vmatmul.msk.f32.vlgmr.msra.gmra.mxu1 %vm405_vm14, %v348_v42  ;;  %v387_v54 = vsel %vm101_vm2, %v353_v16, %v363_v52  ;;  %vm464_vm2 = vweird.f32 %v771_v5 }
 0x1be   :  { %v465_v16 = vsel %vm464_vm2, %v771_v5, %v463_v22 }
 0x1c2   :  { %v372_v46 = vpop.permute.xlu1 %371 }
 0x1c3   :  { %v388_v48 = vsel %vm213_vm4, %v386_v45, %v372_v46 }
 0x1c4   :  { %v390_v49 = vsel %vm347_vm15, %v388_v48, %v381_v38 }
 0x1c5   :  { %v395_v50 = vrot.slane %v390_v49, 2 }
 0x1c7   :  { %v399_v53 = vsel %vm394_vm0, %v349_v51, %v395_v50 }
 0x1c8   :  { %751 = vmatmul.msk.f32.gmra.mxu1 %vm405_vm14, %v399_v53 }
 0x1ca   :  { %v374_v55 = vpop.permute.xlu1 %373 }
 0x1cb   :  { %v389_v57 = vsel %vm213_vm4, %v387_v54, %v374_v55 }
 0x1cc   :  { %v391_v58 = vsel %vm347_vm15, %v389_v57, %v383_v56  ;;  %v504_v57 = vperm.slane %v986_v39, 2 }
 0x1cd   :  { %v396_v59 = vrot.slane %v391_v58, 2 }
 0x1cf   :  { %v397_v60 = vsel %vm394_vm0, %v395_v50, %v396_v59 }
 0x1d0   :  { %752 = vmatmul.msk.f32.gmra.mxu1 %vm405_vm14, %v397_v60 }
 0x1d8   :  { %753 = vmatmul.msk.f32.gmra.mxu1 %vm405_vm14, %v396_v59  ;;  %v509_v59 = vperm.slane %v986_v39, 3 }
 0x23a   :  { %v433_v61 = vpop.f32.mrf.mxu1 }
 0x23b   :  { %v434_v3 = vadd.f32 %v433_v61, %v404_v0 }
 0x23d   :  { %v445_v7 = vsel %vm213_vm4, %v434_v3, 0.0 }
 0x245   :  { %v436_v62 = vpop.f32.mrf.mxu1 }
 0x246   :  { %v437_v2 = vadd.f32 %v436_v62, %v404_v0 }
 0x248   :  { %v446_v6 = vsel %vm213_vm4, %v437_v2, 0.0 }
 0x249   :  { %v447_v11 = vadd.f32 %v446_v6, %v445_v7 }
 0x24d   :  { %v439_v1 = vpop.f32.mrf.mxu1 }
 0x24e   :  { %v440_v4 = vadd.f32 %v439_v1, %v404_v0 }
 0x250   :  { %v448_v9 = vsel %vm213_vm4, %v440_v4, 0.0 }
 0x251   :  { %v449_v14 = vadd.f32 %v448_v9, %v447_v11 }
 0x255   :  { %v442_v12 = vpop.f32.mrf.mxu1 }
 0x256   :  { %v443_v13 = vadd.f32 %v442_v12, %v404_v0 }
 0x258   :  { %v451_v15 = vsel %vm450_vm1, %v443_v13, 0.0 }
 0x259   :  { %v452_v8 = vadd.f32 %v451_v15, %v449_v14 }
 0x25b   :  { %v453_v18 = vrot.slane %v452_v8, 4 }
 0x25d   :  { %v454_v20 = vadd.f32 %v453_v18, %v452_v8 }
 0x25f   :  { %v455_v21 = vrot.slane %v454_v20, 2 }
 0x261   :  { %v456_v23 = vadd.f32 %v455_v21, %v454_v20 }
 0x263   :  { %v457_v24 = vrot.slane %v456_v23, 1 }
 0x265   :  { %v458_v26 = vadd.f32 %v457_v24, %v456_v23 }
 0x267   :  { %v466_v27 = vmul.f32 %v465_v16, %v458_v26  ;;  %v580_v26 = vld [vmem:[%s1107_s3 + $0x30] sm:$0xff] }
 0x269   :  { %v467_v28 = vsub.f32 %v434_v3, %v466_v27  ;;  %v468_v29 = vsub.f32 %v437_v2, %v466_v27  ;;  %v469_v30 = vsub.f32 %v440_v4, %v466_v27  ;;  %v470_v25 = vsub.f32 %v443_v13, %v466_v27  ;;  %v579_v27 = vld [vmem:[%s1107_s3 + $0x28] sm:$0xff] }
 0x26b   :  { %v471_v32 = vmul.f32 %v467_v28, %v467_v28  ;;  %v472_v33 = vmul.f32 %v468_v29, %v468_v29  ;;  %v473_v34 = vmul.f32 %v469_v30, %v469_v30  ;;  %v474_v35 = vmul.f32 %v470_v25, %v470_v25 }
 0x26d   :  { %v475_v36 = vsel %vm213_vm4, %v471_v32, 0.0  ;;  %v476_v37 = vsel %vm213_vm4, %v472_v33, 0.0  ;;  %v478_v40 = vsel %vm213_vm4, %v473_v34, 0.0  ;;  %v480_v42 = vsel %vm450_vm1, %v474_v35, 0.0  ;;  %v574_v32 = vld [vmem:[%s1107_s3] sm:$0xff] }
 0x26e   :  { %v477_v31 = vadd.f32 %v476_v37, %v475_v36 }
 0x270   :  { %v479_v41 = vadd.f32 %v478_v40, %v477_v31 }
 0x272   :  { %v481_v38 = vadd.f32 %v480_v42, %v479_v41 }
 0x274   :  { %v482_v43 = vrot.slane %v481_v38, 4 }
 0x276   :  { %v483_v44 = vadd.f32 %v482_v43, %v481_v38 }
 0x278   :  { %v484_v45 = vrot.slane %v483_v44, 2 }
 0x27a   :  { %v485_v46 = vadd.f32 %v484_v45, %v483_v44 }
 0x27c   :  { %v486_v47 = vrot.slane %v485_v46, 1 }
 0x27e   :  { %v487_v48 = vadd.f32 %v486_v47, %v485_v46  ;;  %v794_v47 = vmov 12.0  }
 0x280   :  { %v488_v49 = vmul.f32 %v487_v48, %v465_v16  ;;  %v581_v16 = vld [vmem:[%s1107_s3 + $0x38] sm:$0xff] }
 0x281   :  { %597 = vmatpush.msra.mxu2 %v581_v16 }
 0x282   :  { %v489_v50 = vadd.f32 1e-05, %v488_v49  ;;  %v582_v49 = vperm.slane %v986_v39, 4 }
 0x283   :  { %598 = vmatpush.msra.mxu2 %v580_v26 }
 0x284   :  { %772 = vrsqrt.f32 %v489_v50  ;;  %vm496_vm5 = vweird.f32 %v489_v50 }
 0x285   :  { %599 = vmatpush.msra.mxu2 %v579_v27  ;;  %774 = vrcp.f32 %v794_v47  ;;  %v657_v27 = vperm.slane %v986_v39, 5 }
 0x28a   :  { %v773_v51 = vpop.eup %772 }
 0x28b   :  { %v491_v52 = vmul.f32 %v773_v51, %v489_v50  ;;  %vm497_vm3 = vweird.f32 %v773_v51  ;;  %v775_v50 = vpop.eup %774 }
 0x28c   :  { %vm498_vm6 = vmor %vm496_vm5, %vm497_vm3  ;;  %vm627_vm13 = vweird.f32 %v775_v50 }
 0x28d   :  { %v492_v53 = vmul.f32 %v773_v51, %v491_v52  ;;  %v623_v52 = vmul.f32 12.0, %v775_v50 }
 0x28f   :  { %v493_v54 = vmul.f32 0.5, %v492_v53 }
 0x291   :  { %v494_v55 = vsub.f32 1.5, %v493_v54 }
 0x293   :  { %v495_v56 = vmul.f32 %v773_v51, %v494_v55 }
 0x295   :  { %v499_v58 = vsel %vm498_vm6, %v773_v51, %v495_v56 }
 0x296   :  { %v500_v60 = vmul.f32 %v499_v58, %v467_v28  ;;  %v501_v61 = vmul.f32 %v499_v58, %v468_v29  ;;  %v502_v62 = vmul.f32 %v499_v58, %v469_v30  ;;  %v503_v63 = vmul.f32 %v499_v58, %v470_v25  ;;  %v578_v28 = vld [vmem:[%s1107_s3 + $0x20] sm:$0xff]  ;;  %v577_v29 = vld [vmem:[%s1107_s3 + $0x18] sm:$0xff]  ;;  %v576_v30 = vld [vmem:[%s1107_s3 + $0x10] sm:$0xff] }
 0x297   :  { %600 = vmatpush.msra.mxu2 %v578_v28  ;;  %v575_v25 = vld [vmem:[%s1107_s3 + $0x8] sm:$0xff] }
 0x298   :  { %v505_v0 = vmul.f32 %v504_v57, %v500_v60  ;;  %v506_v1 = vmul.f32 %v504_v57, %v501_v61  ;;  %v507_v2 = vmul.f32 %v504_v57, %v502_v62  ;;  %v508_v3 = vmul.f32 %v504_v57, %v503_v63 }
 0x299   :  { %601 = vmatpush.msra.mxu2 %v577_v29  ;;  %v624_v57 = vsub.f32 1.0, %v623_v52 }
 0x29a   :  { %v510_v4 = vadd.f32 %v509_v59, %v505_v0  ;;  %v511_v5 = vadd.f32 %v509_v59, %v506_v1  ;;  %v512_v6 = vadd.f32 %v509_v59, %v507_v2  ;;  %v513_v7 = vadd.f32 %v509_v59, %v508_v3 }
 0x29b   :  { %602 = vmatpush.msra.mxu2 %v576_v30  ;;  %v625_v60 = vmul.f32 %v775_v50, %v624_v57 }
 0x29c   :  { %vm514_vm7 = vcmp.gt.f32.partialorder %v510_v4, 0.0  ;;  %vm515_vm8 = vcmp.gt.f32.partialorder %v511_v5, 0.0  ;;  %vm516_vm9 = vcmp.gt.f32.partialorder %v512_v6, 0.0  ;;  %vm517_vm10 = vcmp.gt.f32.partialorder %v513_v7, 0.0 }
 0x29d   :  { %v518_v9 = vmul.f32 0.2, %v510_v4  ;;  %v519_v10 = vmul.f32 0.2, %v511_v5  ;;  %v520_v11 = vmul.f32 0.2, %v512_v6  ;;  %603 = vmatpush.msra.mxu2 %v575_v25  ;;  %v626_v63 = vadd.f32 %v775_v50, %v625_v60 }
 0x29e   :  { %v521_v12 = vmul.f32 0.2, %v513_v7  ;;  %v660_v25 = vperm.slane %v986_v39, 6 }
 0x29f   :  { %v522_v13 = vsel %vm514_vm7, %v510_v4, %v518_v9  ;;  %v523_v14 = vsel %vm515_vm8, %v511_v5, %v519_v10  ;;  %v524_v15 = vsel %vm516_vm9, %v512_v6, %v520_v11  ;;  %604 = vmatpush.msra.mxu2 %v574_v32  ;;  %v628_v2 = vsel %vm627_vm13, %v775_v50, %v626_v63 }
 0x2a0   :  { %v525_v17 = vsel %vm517_vm10, %v513_v7, %v521_v12  ;;  %526 = vst.msk [vmem:[#allocation3] sm:$0xff] %vm213_vm4, %v522_v13  ;;  %vm721_vm7 = vcmask 3072  }
 0x2a1   :  { %527 = vst.msk [vmem:[#allocation3 + $0x8] sm:$0xff] %vm213_vm4, %v523_v14 }
 0x2a2   :  { %528 = vst.msk [vmem:[#allocation3 + $0x10] sm:$0xff] %vm213_vm4, %v524_v15 }
 0x2a3   :  { %529 = vst.msk [vmem:[#allocation3 + $0x18] sm:$0xf] %vm450_vm1, %v525_v17 }
 0x2a8   :  { %v532_v8 = vld [vmem:[#allocation3 + $0x1] ss:$2 sm:$0x7f]  ;;  %v530_v22 = vld [vmem:[#allocation3] ss:$2 sm:$0x7f] }
 0x2a9   :  { %534 = vrot.lane.b32.xlu2 %v532_v8, %s789_s7  ;;  %v542_v21 = vrot.slane %v532_v8, 1  ;;  %v538_v24 = vrot.slane %v530_v22, 1 }
 0x2aa   :  { %v553_v18 = vld [vmem:[#allocation3 + $0xf] ss:$2 sm:$0x7f]  ;;  %v551_v19 = vld [vmem:[#allocation3 + $0xe] ss:$2 sm:$0x7f] }
 0x2ab   :  { %555 = vrot.lane.b32.xlu0 %v553_v18, %s789_s7  ;;  %v559_v20 = vrot.slane %v551_v19, 1  ;;  %v563_v23 = vrot.slane %v553_v18, 1 }
 0x2ad   :  { %560 = vrot.lane.b32.xlu1 %v559_v20, %s792_s2 }
 0x2b1   :  { %543 = vrot.lane.b32.xlu2 %v542_v21, %s793_s17 }
 0x2b3   :  { %564 = vrot.lane.b32.xlu0 %v563_v23, %s793_s17 }
 0x2b5   :  { %539 = vrot.lane.b32.xlu1 %v538_v24, %s792_s2 }
 0x303   :  { %v535_v34 = vpop.permute.xlu2 %534 }
 0x304   :  { %v546_v41 = vsel %vm213_vm4, %v530_v22, %v535_v34 }
 0x30b   :  { %v544_v43 = vpop.permute.xlu2 %543 }
 0x31d   :  { %v556_v33 = vpop.permute.xlu0 %555 }
 0x31e   :  { %v567_v36 = vsel %vm213_vm4, %v551_v19, %v556_v33  ;;  %vm613_vm4 = vcmask 257024  }
 0x31f   :  { %v561_v35 = vpop.permute.xlu1 %560 }
 0x320   :  { %v568_v37 = vsel %vm405_vm14, %v567_v36, %v561_v35  ;;  %v669_v36 = vperm.slane %v986_v39, 7 }
 0x325   :  { %v565_v31 = vpop.permute.xlu0 %564 }
 0x326   :  { %v569_v40 = vsel %vm548_vm11, %v568_v37, %v565_v31 }
 0x327   :  { %v571_v42 = vrot.slane %v569_v40, 2  ;;  %v540_v38 = vpop.permute.xlu1 %539 }
 0x328   :  { %v547_v44 = vsel %vm405_vm14, %v546_v41, %v540_v38 }
 0x329   :  { %v549_v45 = vsel %vm548_vm11, %v547_v44, %v544_v43  ;;  %vm719_vm11 = vcmask 7168  }
 0x32a   :  { %v573_v46 = vsel %vm394_vm0, %v549_v45, %v571_v42  ;;  %v769_v45 = vld [vmem:[%s1104_s4 + $0x8] ss:$0 sm:$0xff] }
 0x32b   :  { %754 = vmatmul.msk.f32.vlgmr.msra.gmra.mxu2 %vm583_vm12, %v573_v46 }
 0x333   :  { %755 = vmatmul.msk.f32.gmra.mxu2 %vm583_vm12, %v571_v42 }
 0x3ae   :  { %v606_v48 = vpop.f32.mrf.mxu2 }
 0x3af   :  { %v607_v51 = vadd.f32 %v606_v48, %v582_v49 }
 0x3b1   :  { %v612_v55 = vsel %vm405_vm14, %v607_v51, 0.0 }
 0x3b6   :  { %v609_v53 = vpop.f32.mrf.mxu2 }
 0x3b7   :  { %v610_v54 = vadd.f32 %v609_v53, %v582_v49 }
 0x3b9   :  { %v614_v56 = vsel %vm613_vm4, %v610_v54, 0.0 }
 0x3ba   :  { %v615_v58 = vadd.f32 %v614_v56, %v612_v55 }
 0x3bc   :  { %v616_v59 = vrot.slane %v615_v58, 4 }
 0x3be   :  { %v617_v61 = vadd.f32 %v616_v59, %v615_v58 }
 0x3c0   :  { %v618_v62 = vrot.slane %v617_v61, 2 }
 0x3c2   :  { %v619_v0 = vadd.f32 %v618_v62, %v617_v61 }
 0x3c4   :  { %v620_v1 = vrot.slane %v619_v0, 1 }
 0x3c6   :  { %v621_v3 = vadd.f32 %v620_v1, %v619_v0 }
 0x3c8   :  { %v629_v4 = vmul.f32 %v628_v2, %v621_v3 }
 0x3ca   :  { %v630_v5 = vsub.f32 %v607_v51, %v629_v4  ;;  %v631_v6 = vsub.f32 %v610_v54, %v629_v4 }
 0x3cc   :  { %v632_v7 = vmul.f32 %v630_v5, %v630_v5  ;;  %v633_v9 = vmul.f32 %v631_v6, %v631_v6 }
 0x3ce   :  { %v634_v10 = vsel %vm405_vm14, %v632_v7, 0.0  ;;  %v635_v11 = vsel %vm613_vm4, %v633_v9, 0.0 }
 0x3cf   :  { %v636_v12 = vadd.f32 %v635_v11, %v634_v10 }
 0x3d1   :  { %v637_v13 = vrot.slane %v636_v12, 4 }
 0x3d3   :  { %v638_v14 = vadd.f32 %v637_v13, %v636_v12 }
 0x3d5   :  { %v639_v15 = vrot.slane %v638_v14, 2 }
 0x3d7   :  { %v640_v17 = vadd.f32 %v639_v15, %v638_v14 }
 0x3d9   :  { %v641_v8 = vrot.slane %v640_v17, 1 }
 0x3db   :  { %v642_v18 = vadd.f32 %v641_v8, %v640_v17 }
 0x3dd   :  { %v643_v19 = vmul.f32 %v642_v18, %v628_v2 }
 0x3df   :  { %v644_v20 = vadd.f32 1e-05, %v643_v19 }
 0x3e1   :  { %776 = vrsqrt.f32 %v644_v20  ;;  %vm651_vm0 = vweird.f32 %v644_v20 }
 0x3e7   :  { %v777_v21 = vpop.eup %776 }
 0x3e8   :  { %v646_v22 = vmul.f32 %v777_v21, %v644_v20  ;;  %vm652_vm15 = vweird.f32 %v777_v21 }
 0x3e9   :  { %vm653_vm1 = vmor %vm651_vm0, %vm652_vm15 }
 0x3ea   :  { %v647_v23 = vmul.f32 %v777_v21, %v646_v22 }
 0x3ec   :  { %v648_v24 = vmul.f32 0.5, %v647_v23 }
 0x3ee   :  { %v649_v16 = vsub.f32 1.5, %v648_v24 }
 0x3f0   :  { %v650_v26 = vmul.f32 %v777_v21, %v649_v16 }
 0x3f2   :  { %v654_v28 = vsel %vm653_vm1, %v777_v21, %v650_v26 }
 0x3f3   :  { %v655_v29 = vmul.f32 %v654_v28, %v630_v5  ;;  %v656_v30 = vmul.f32 %v654_v28, %v631_v6 }
 0x3f5   :  { %v658_v32 = vmul.f32 %v657_v27, %v655_v29  ;;  %v659_v33 = vmul.f32 %v657_v27, %v656_v30 }
 0x3f7   :  { %v662_v34 = vadd.f32 %v660_v25, %v659_v33  ;;  %v661_v35 = vadd.f32 %v660_v25, %v658_v32 }
 0x3f9   :  { %vm664_vm2 = vcmp.gt.f32.partialorder %v662_v34, 0.0  ;;  %v666_v37 = vmul.f32 0.2, %v662_v34  ;;  %vm663_vm3 = vcmp.gt.f32.partialorder %v661_v35, 0.0  ;;  %v665_v31 = vmul.f32 0.2, %v661_v35 }
 0x3fb   :  { %v668_v40 = vsel %vm664_vm2, %v662_v34, %v666_v37  ;;  %v667_v41 = vsel %vm663_vm3, %v661_v35, %v665_v31 }
 0x3fc   :  { %v671_v42 = vmul.f32 %v669_v36, %v668_v40  ;;  %v670_v38 = vmul.f32 %v669_v36, %v667_v41 }
 0x3fe   :  { %v675_v43 = vsel %vm613_vm4, %v671_v42, 0.0  ;;  %v672_v44 = vsel %vm405_vm14, %v670_v38, 0.0 }
 0x3ff   :  { %676 = vadd.xlane.f32.xlu1 %v675_v43  ;;  %673 = vadd.xlane.f32.xlu0 %v672_v44 }
 0x472   :  { %v677_v46 = vpop.xlane.xlu1 %676  ;;  %v674_v39 = vpop.xlane.xlu0 %673 }
 0x473   :  { %v680_v47 = vadd.f32 %v769_v45, %v677_v46  ;;  %v679_v48 = vadd.f32 %v769_v45, %v674_v39 }
 0x475   :  { %v757_v49 = vmul.f32 -1.442695, %v680_v47  ;;  %v756_v50 = vmul.f32 -1.442695, %v679_v48 }
 0x477   :  { %778 = vpow2.f32 %v757_v49 }
 0x478   :  { %780 = vpow2.f32 %v756_v50 }
 0x47d   :  { %v779_v51 = vpop.eup %778 }
 0x47e   :  { %v781_v52 = vpop.eup %780  ;;  %v688_v53 = vadd.f32 1.0, %v779_v51 }
 0x47f   :  { %v687_v54 = vadd.f32 1.0, %v781_v52 }
 0x480   :  { %782 = vrcp.f32 %v688_v53  ;;  %v715_v60 = vand.u32 2147483648, %v688_v53  ;;  %v713_v63 = vand.u32 2147483647, %v688_v53  ;;  %vm709_vm6 = vweird.f32 %v688_v53 }
 0x481   :  { %784 = vrcp.f32 %v687_v54  ;;  %v700_v0 = vand.u32 2147483648, %v687_v54  ;;  %v698_v2 = vand.u32 2147483647, %v687_v54  ;;  %vm694_vm9 = vweird.f32 %v687_v54 }
 0x482   :  { %v716_v4 = vor.u32 1.1754944e-38, %v715_v60  ;;  %vm714_vm10 = vcmp.eq.f32.partialorder %v713_v63, 8.507059e+37 }
 0x483   :  { %v701_v7 = vor.u32 1.1754944e-38, %v700_v0  ;;  %vm699_vm4 = vcmp.eq.f32.partialorder %v698_v2, 8.507059e+37 }
 0x486   :  { %v783_v55 = vpop.eup %782 }
 0x487   :  { %v785_v56 = vpop.eup %784  ;;  %v705_v57 = vmul.f32 %v783_v55, %v688_v53  ;;  %vm710_vm14 = vweird.f32 %v783_v55 }
 0x488   :  { %v690_v58 = vmul.f32 %v785_v56, %v687_v54  ;;  %vm695_vm5 = vweird.f32 %v785_v56  ;;  %vm711_vm8 = vmor %vm709_vm6, %vm710_vm14 }
 0x489   :  { %v706_v59 = vsub.f32 1.0, %v705_v57  ;;  %vm696_vm12 = vmor %vm694_vm9, %vm695_vm5 }
 0x48a   :  { %v691_v61 = vsub.f32 1.0, %v690_v58 }
 0x48b   :  { %v707_v62 = vmul.f32 %v783_v55, %v706_v59 }
 0x48c   :  { %v692_v1 = vmul.f32 %v785_v56, %v691_v61 }
 0x48d   :  { %v708_v3 = vadd.f32 %v783_v55, %v707_v62 }
 0x48e   :  { %v693_v5 = vadd.f32 %v785_v56, %v692_v1 }
 0x48f   :  { %v712_v6 = vsel %vm711_vm8, %v783_v55, %v708_v3 }
 0x490   :  { %v717_v9 = vsel %vm714_vm10, %v716_v4, %v712_v6  ;;  %v697_v10 = vsel %vm696_vm12, %v785_v56, %v693_v5 }
 0x491   :  { %722 = vst.msk [vmem:[%s1108_s5 + $0x8] sm:$0xf] %vm721_vm7, %v717_v9  ;;  %v702_v11 = vsel %vm699_vm4, %v701_v7, %v697_v10 }
 0x492   :  { %720 = vst.msk [vmem:[%s1108_s5] sm:$0xff] %vm719_vm11, %v702_v11 }

</bundles_post_ra>
